<compile_context>
chip_gen: v7x
topology: tpu7x:2x2x1
jax: 0.10.0
libtpu: 0.0.40
codegen_flags: <defaults>
</compile_context>

<pallas_src>
import functools

import jax
import jax.numpy as jnp
from jax import lax
from jax.experimental import pallas as pl
from jax.experimental.pallas import tpu as pltpu

BN_EPS = 1e-5


def _round_up(n: int, m: int) -> int:
    return ((n + m - 1) // m) * m


def mlp_cls_kernel(x_ref, gamma_ref, beta_ref, w_ref, b_ref, o_ref,
                   sum_ref, sumsq_ref, scale_ref, shift_ref,
                   *, inv_b: float, eps: float, matmul_dtype):
    """Two-phase kernel over grid (phase, batch_tile).

    phase 0: accumulate per-feature sum / sum-of-squares of the class tokens
             (single pass over x; column sums done with a ones-vector matmul
             on the otherwise-idle MXU instead of a cross-sublane reduction).
    phase 1: at tile 0 fold full-batch mean/var with gamma/beta into a single
             scale/shift; then per tile: x*scale+shift (one FMA), Linear on the
             MXU (weight kept in (C, D) layout via dot_general), ReLU.
             Dropout(p=0.0) is the identity.
    """
    phase = pl.program_id(0)
    tile = pl.program_id(1)

    @pl.when(jnp.logical_and(phase == 0, tile == 0))
    def _init():
        sum_ref[...] = jnp.zeros_like(sum_ref)
        sumsq_ref[...] = jnp.zeros_like(sumsq_ref)

    @pl.when(phase == 0)
    def _accumulate_stats():
        xt = x_ref[...].astype(jnp.float32)                    # (BT, Dp)
        ones = jnp.ones((1, xt.shape[0]), jnp.float32)         # (1, BT)
        sum_ref[...] += jnp.dot(ones, xt,
                                preferred_element_type=jnp.float32)
        sumsq_ref[...] += jnp.dot(ones, xt * xt,
                                  preferred_element_type=jnp.float32)

    @pl.when(jnp.logical_and(phase == 1, tile == 0))
    def _finalize_stats():
        mean = sum_ref[...] * inv_b
        var = sumsq_ref[...] * inv_b - mean * mean              # biased variance
        var = jnp.maximum(var, 0.0)                             # guard rounding
        scale = gamma_ref[...] * lax.rsqrt(var + eps)
        scale_ref[...] = scale
        shift_ref[...] = beta_ref[...] - mean * scale

    @pl.when(phase == 1)
    def _apply():
        xt = x_ref[...].astype(jnp.float32)                     # (BT, Dp)
        h = xt * scale_ref[...] + shift_ref[...]                # BN as one FMA
        h = h.astype(matmul_dtype)
        w = w_ref[...].astype(matmul_dtype)                     # (Cp, Dp)
        # Contract over D with the weight in PyTorch (C, D) layout: no transpose.
        y = lax.dot_general(h, w,
                            dimension_numbers=(((1,), (1,)), ((), ())),
                            preferred_element_type=jnp.float32)
        y = y + b_ref[...]
        # ReLU; Dropout(p=0.0) is identity.
        o_ref[...] = jnp.maximum(y, 0.0).astype(o_ref.dtype)


def mlp_cls_forward(x, gamma, beta, weight, bias, *,
                    b_tile=None, matmul_dtype=jnp.float32):
    """x: (B, S, D); gamma/beta: (D,); weight: (C, D) PyTorch layout; bias: (C,).

    Returns (B, C) float32 (training-mode BatchNorm1d over the batch axis).
    """
    B, S, D = x.shape
    C = weight.shape[0]

    # Only the class token is used -> slice before pallas_call so the kernel
    # never DMAs the (B, S, D) tensor.
    cls = x[:, 0, :].astype(jnp.float32)                        # (B, D)

    # Lane-dense padding: D and C to multiples of 128. Zero padding keeps the
    # batch statistics and the matmul exact; padded rows/cols are sliced off.
    Dp = _round_up(max(D, 128), 128)
    Cp = _round_up(max(C, 128), 128)

    if b_tile is None:
        # Sublane-aligned batch tile, capped so double-buffered input tiles
        # stay well inside v7x's 64 MiB VMEM.  TODO(synk): sweep per chip.
        b_tile = min(512, _round_up(B, 8))
    b_tile = _round_up(b_tile, 8)
    Bp = _round_up(B, b_tile)
    nb = Bp // b_tile

    cls_p = jnp.pad(cls, ((0, Bp - B), (0, Dp - D)))
    gamma_p = jnp.pad(gamma.astype(jnp.float32), (0, Dp - D)).reshape(1, Dp)
    beta_p = jnp.pad(beta.astype(jnp.float32), (0, Dp - D)).reshape(1, Dp)
    # Weight stays in (C, D) layout (no per-call transpose). Padding is done
    # here for the demo; in a real model pad once at parameter-init time.
    weight_p = jnp.pad(weight.astype(jnp.float32), ((0, Cp - C), (0, Dp - D)))
    bias_p = jnp.pad(bias.astype(jnp.float32), (0, Cp - C)).reshape(1, Cp)

    kernel = functools.partial(
        mlp_cls_kernel, inv_b=1.0 / float(B), eps=BN_EPS,
        matmul_dtype=matmul_dtype)

    out = pl.pallas_call(
        kernel,
        out_shape=jax.ShapeDtypeStruct((Bp, Cp), jnp.float32),
        grid_spec=pltpu.PrefetchScalarGridSpec(
            num_scalar_prefetch=0,
            grid=(2, nb),                                   # (phase, batch tile)
            in_specs=[
                pl.BlockSpec((b_tile, Dp), lambda p, i: (i, 0)),  # class tokens
                pl.BlockSpec((1, Dp), lambda p, i: (0, 0)),       # gamma
                pl.BlockSpec((1, Dp), lambda p, i: (0, 0)),       # beta
                pl.BlockSpec((Cp, Dp), lambda p, i: (0, 0)),      # weight (C, D)
                pl.BlockSpec((1, Cp), lambda p, i: (0, 0)),       # bias
            ],
            # Output block index only advances in phase 1 (i * p), so every
            # output tile is written exactly once, with finalized values.
            out_specs=pl.BlockSpec((b_tile, Cp), lambda p, i: (i * p, 0)),
            scratch_shapes=[
                pltpu.VMEM((1, Dp), jnp.float32),   # sum
                pltpu.VMEM((1, Dp), jnp.float32),   # sum of squares
                pltpu.VMEM((1, Dp), jnp.float32),   # folded scale
                pltpu.VMEM((1, Dp), jnp.float32),   # folded shift
            ],
        ),
        compiler_params=pltpu.CompilerParams(
            # Both axes sequential: phase 1 needs the full-batch statistics
            # accumulated into scratch during phase 0 (same TensorCore).
            dimension_semantics=("arbitrary", "arbitrary"),
        ),
    )(cls_p, gamma_p, beta_p, weight_p, bias_p)

    return out[:B, :C]


def mlp_cls_reference(x, gamma, beta, weight, bias):
    cls = x[:, 0, :]
    mean = jnp.mean(cls, axis=0, keepdims=True)
    var = jnp.mean((cls - mean) ** 2, axis=0, keepdims=True)
    h = (cls - mean) / jnp.sqrt(var + BN_EPS) * gamma + beta
    y = h @ weight.T + bias
    return jnp.maximum(y, 0.0)


if __name__ == "__main__":
    B, S, D, C = 8, 8, 32, 16            # batch, seqLength, d_model, n_class

    key = jax.random.PRNGKey(0)
    kx, kw, kb, kg, kbeta = jax.random.split(key, 5)

    x = jax.random.normal(kx, (B, S, D), dtype=jnp.float32)

    # Parameters (shapes from nn.BatchNorm1d(D), nn.Linear(D, C)); random
    # gamma/beta to exercise the folded scale/shift path.
    gamma = 1.0 + 0.1 * jax.random.normal(kg, (D,), jnp.float32)
    beta = 0.1 * jax.random.normal(kbeta, (D,), jnp.float32)
    bound = 1.0 / float(D) ** 0.5
    weight = jax.random.uniform(kw, (C, D), jnp.float32, -bound, bound)
    bias = jax.random.uniform(kb, (C,), jnp.float32, -bound, bound)

    # matmul_dtype=jnp.bfloat16 gives full MXU rate on v6e/v7x (loosen the
    # tolerance accordingly); f32 here to keep the 1e-4 match vs. reference.
    out = mlp_cls_forward(x, gamma, beta, weight, bias,
                          matmul_dtype=jnp.float32)
    out = jax.block_until_ready(out)

    ref = mlp_cls_reference(x, gamma, beta, weight, bias)
    assert out.shape == (B, C)
    assert jnp.allclose(out, ref, atol=1e-4, rtol=1e-4), "mismatch vs reference"

    # TODO(synk): dropout with p > 0 (training mode) would need pltpu.prng_*
    # masking, and stateful running_mean/running_var updates are not modeled;
    # the module default p=0.0 makes dropout an identity here.
    print("KERNEL_OK")
</pallas_src>

<mosaic_0001>
module attributes {stable_mosaic.version = 11 : i64} {
  func.func @mlp_cls_kernel(%arg0: i32, %arg1: i32, %arg2: memref<8x128xf32, #tpu.memory_space<vmem>>, %arg3: memref<1x128xf32, #tpu.memory_space<vmem>>, %arg4: memref<1x128xf32, #tpu.memory_space<vmem>>, %arg5: memref<128x128xf32, #tpu.memory_space<vmem>>, %arg6: memref<1x128xf32, #tpu.memory_space<vmem>>, %arg7: memref<8x128xf32, #tpu.memory_space<vmem>>, %arg8: memref<1x128xf32, #tpu.memory_space<vmem>>, %arg9: memref<1x128xf32, #tpu.memory_space<vmem>>, %arg10: memref<1x128xf32, #tpu.memory_space<vmem>>, %arg11: memref<1x128xf32, #tpu.memory_space<vmem>>) attributes {dimension_semantics = [#tpu.dimension_semantics<arbitrary>, #tpu.dimension_semantics<arbitrary>], iteration_bounds = array<i64: 2, 1>, scalar_prefetch = 0 : i64, scratch_operands = 4 : i64, tpu.core_type = #tpu.core_type<tc>, window_params = [{transform_indices = @transform_0, window_bounds = array<i64: 8, 128>}, {pipeline_mode = #tpu.pipeline_mode<synchronous>, transform_indices = @transform_1, window_bounds = array<i64: 1, 128>}, {pipeline_mode = #tpu.pipeline_mode<synchronous>, transform_indices = @transform_2, window_bounds = array<i64: 1, 128>}, {pipeline_mode = #tpu.pipeline_mode<synchronous>, transform_indices = @transform_3, window_bounds = array<i64: 128, 128>}, {pipeline_mode = #tpu.pipeline_mode<synchronous>, transform_indices = @transform_4, window_bounds = array<i64: 1, 128>}, {transform_indices = @transform_5, window_bounds = array<i64: 8, 128>}]} {
    %c0_i32 = arith.constant 0 : i32
    %0 = arith.cmpi eq, %arg0, %c0_i32 : i32
    %c0_i32_0 = arith.constant 0 : i32
    %1 = arith.cmpi eq, %arg1, %c0_i32_0 : i32
    %2 = arith.andi %0, %1 : i1
    %3 = arith.extui %2 : i1 to i32
    %c0_i32_1 = arith.constant 0 : i32
    %4 = arith.cmpi ne, %3, %c0_i32_1 : i32
    scf.if %4 {
      %cst = arith.constant 0.000000e+00 : f32
      %16 = vector.broadcast %cst : f32 to vector<1x128xf32>
      %c0 = arith.constant 0 : index
      %c0_8 = arith.constant 0 : index
      %17 = vector.load %arg8[%c0, %c0_8] : memref<1x128xf32, #tpu.memory_space<vmem>>, vector<1x128xf32>
      tpu.vector_store %arg8[%c0, %c0_8], %16 {strides = array<i32>} : memref<1x128xf32, #tpu.memory_space<vmem>>, vector<1x128xf32>,
      %cst_9 = arith.constant 0.000000e+00 : f32
      %18 = vector.broadcast %cst_9 : f32 to vector<1x128xf32>
      %c0_10 = arith.constant 0 : index
      %c0_11 = arith.constant 0 : index
      %19 = vector.load %arg9[%c0_10, %c0_11] : memref<1x128xf32, #tpu.memory_space<vmem>>, vector<1x128xf32>
      tpu.vector_store %arg9[%c0_10, %c0_11], %18 {strides = array<i32>} : memref<1x128xf32, #tpu.memory_space<vmem>>, vector<1x128xf32>,
    } else {
    }
    %c0_i32_2 = arith.constant 0 : i32
    %5 = arith.cmpi eq, %arg0, %c0_i32_2 : i32
    %6 = arith.extui %5 : i1 to i32
    %c0_i32_3 = arith.constant 0 : i32
    %7 = arith.cmpi ne, %6, %c0_i32_3 : i32
    scf.if %7 {
      %c0 = arith.constant 0 : index
      %c0_8 = arith.constant 0 : index
      %16 = vector.load %arg2[%c0, %c0_8] : memref<8x128xf32, #tpu.memory_space<vmem>>, vector<8x128xf32>
      %cst = arith.constant 1.000000e+00 : f32
      %17 = vector.broadcast %cst : f32 to vector<1x8xf32>
      %c0_9 = arith.constant 0 : index
      %c0_10 = arith.constant 0 : index
      %18 = vector.load %arg8[%c0_9, %c0_10] : memref<1x128xf32, #tpu.memory_space<vmem>>, vector<1x128xf32>
      %cst_11 = arith.constant dense<0.000000e+00> : vector<1x128xf32>
      %19 = tpu.matmul %17, %16, %cst_11 {dimension_numbers = #tpu.dot_dimension_numbers<[1], [0], [0], [1], [0, 0, 1, 1], [], []>} : vector<1x8xf32>, vector<8x128xf32>, vector<1x128xf32> -> vector<1x128xf32>
      %20 = arith.addf %18, %19 : vector<1x128xf32>
      %c0_12 = arith.constant 0 : index
      %c0_13 = arith.constant 0 : index
      %21 = vector.load %arg8[%c0_12, %c0_13] : memref<1x128xf32, #tpu.memory_space<vmem>>, vector<1x128xf32>
      tpu.vector_store %arg8[%c0_12, %c0_13], %20 {strides = array<i32>} : memref<1x128xf32, #tpu.memory_space<vmem>>, vector<1x128xf32>,
      %c0_14 = arith.constant 0 : index
      %c0_15 = arith.constant 0 : index
      %22 = vector.load %arg9[%c0_14, %c0_15] : memref<1x128xf32, #tpu.memory_space<vmem>>, vector<1x128xf32>
      %23 = arith.mulf %16, %16 : vector<8x128xf32>
      %cst_16 = arith.constant dense<0.000000e+00> : vector<1x128xf32>
      %24 = tpu.matmul %17, %23, %cst_16 {dimension_numbers = #tpu.dot_dimension_numbers<[1], [0], [0], [1], [0, 0, 1, 1], [], []>} : vector<1x8xf32>, vector<8x128xf32>, vector<1x128xf32> -> vector<1x128xf32>
      %25 = arith.addf %22, %24 : vector<1x128xf32>
      %c0_17 = arith.constant 0 : index
      %c0_18 = arith.constant 0 : index
      %26 = vector.load %arg9[%c0_17, %c0_18] : memref<1x128xf32, #tpu.memory_space<vmem>>, vector<1x128xf32>
      tpu.vector_store %arg9[%c0_17, %c0_18], %25 {strides = array<i32>} : memref<1x128xf32, #tpu.memory_space<vmem>>, vector<1x128xf32>,
    } else {
    }
    %c1_i32 = arith.constant 1 : i32
    %8 = arith.cmpi eq, %arg0, %c1_i32 : i32
    %c0_i32_4 = arith.constant 0 : i32
    %9 = arith.cmpi eq, %arg1, %c0_i32_4 : i32
    %10 = arith.andi %8, %9 : i1
    %11 = arith.extui %10 : i1 to i32
    %c0_i32_5 = arith.constant 0 : i32
    %12 = arith.cmpi ne, %11, %c0_i32_5 : i32
    scf.if %12 {
      %c0 = arith.constant 0 : index
      %c0_8 = arith.constant 0 : index
      %16 = vector.load %arg8[%c0, %c0_8] : memref<1x128xf32, #tpu.memory_space<vmem>>, vector<1x128xf32>
      %cst = arith.constant 1.250000e-01 : f32
      %17 = vector.broadcast %cst : f32 to vector<1x128xf32>
      %18 = arith.mulf %16, %17 : vector<1x128xf32>
      %c0_9 = arith.constant 0 : index
      %c0_10 = arith.constant 0 : index
      %19 = vector.load %arg9[%c0_9, %c0_10] : memref<1x128xf32, #tpu.memory_space<vmem>>, vector<1x128xf32>
      %cst_11 = arith.constant 1.250000e-01 : f32
      %20 = vector.broadcast %cst_11 : f32 to vector<1x128xf32>
      %21 = arith.mulf %19, %20 : vector<1x128xf32>
      %22 = arith.mulf %18, %18 : vector<1x128xf32>
      %23 = arith.subf %21, %22 : vector<1x128xf32>
      %cst_12 = arith.constant 0.000000e+00 : f32
      %24 = vector.broadcast %cst_12 : f32 to vector<1x128xf32>
      %25 = arith.maximumf %23, %24 : vector<1x128xf32>
      %c0_13 = arith.constant 0 : index
      %c0_14 = arith.constant 0 : index
      %26 = vector.load %arg3[%c0_13, %c0_14] : memref<1x128xf32, #tpu.memory_space<vmem>>, vector<1x128xf32>
      %cst_15 = arith.constant 9.99999974E-6 : f32
      %27 = vector.broadcast %cst_15 : f32 to vector<1x128xf32>
      %28 = arith.addf %25, %27 : vector<1x128xf32>
      %29 = math.rsqrt %28 : vector<1x128xf32>
      %30 = arith.mulf %26, %29 : vector<1x128xf32>
      %c0_16 = arith.constant 0 : index
      %c0_17 = arith.constant 0 : index
      %31 = vector.load %arg10[%c0_16, %c0_17] : memref<1x128xf32, #tpu.memory_space<vmem>>, vector<1x128xf32>
      tpu.vector_store %arg10[%c0_16, %c0_17], %30 {strides = array<i32>} : memref<1x128xf32, #tpu.memory_space<vmem>>, vector<1x128xf32>,
      %c0_18 = arith.constant 0 : index
      %c0_19 = arith.constant 0 : index
      %32 = vector.load %arg4[%c0_18, %c0_19] : memref<1x128xf32, #tpu.memory_space<vmem>>, vector<1x128xf32>
      %33 = arith.mulf %18, %30 : vector<1x128xf32>
      %34 = arith.subf %32, %33 : vector<1x128xf32>
      %c0_20 = arith.constant 0 : index
      %c0_21 = arith.constant 0 : index
      %35 = vector.load %arg11[%c0_20, %c0_21] : memref<1x128xf32, #tpu.memory_space<vmem>>, vector<1x128xf32>
      tpu.vector_store %arg11[%c0_20, %c0_21], %34 {strides = array<i32>} : memref<1x128xf32, #tpu.memory_space<vmem>>, vector<1x128xf32>,
    } else {
    }
    %c1_i32_6 = arith.constant 1 : i32
    %13 = arith.cmpi eq, %arg0, %c1_i32_6 : i32
    %14 = arith.extui %13 : i1 to i32
    %c0_i32_7 = arith.constant 0 : i32
    %15 = arith.cmpi ne, %14, %c0_i32_7 : i32
    scf.if %15 {
      %c0 = arith.constant 0 : index
      %c0_8 = arith.constant 0 : index
      %16 = vector.load %arg2[%c0, %c0_8] : memref<8x128xf32, #tpu.memory_space<vmem>>, vector<8x128xf32>
      %c0_9 = arith.constant 0 : index
      %c0_10 = arith.constant 0 : index
      %17 = vector.load %arg10[%c0_9, %c0_10] : memref<1x128xf32, #tpu.memory_space<vmem>>, vector<1x128xf32>
      %18 = vector.broadcast %17 : vector<1x128xf32> to vector<8x128xf32>
      %19 = arith.mulf %16, %18 : vector<8x128xf32>
      %c0_11 = arith.constant 0 : index
      %c0_12 = arith.constant 0 : index
      %20 = vector.load %arg11[%c0_11, %c0_12] : memref<1x128xf32, #tpu.memory_space<vmem>>, vector<1x128xf32>
      %21 = vector.broadcast %20 : vector<1x128xf32> to vector<8x128xf32>
      %22 = arith.addf %19, %21 : vector<8x128xf32>
      %c0_13 = arith.constant 0 : index
      %c0_14 = arith.constant 0 : index
      %23 = vector.load %arg5[%c0_13, %c0_14] : memref<128x128xf32, #tpu.memory_space<vmem>>, vector<128x128xf32>
      %cst = arith.constant dense<0.000000e+00> : vector<8x128xf32>
      %24 = tpu.matmul %22, %23, %cst {dimension_numbers = #tpu.dot_dimension_numbers<[1], [1], [0], [0], [0, 0, 1, 0], [], []>} : vector<8x128xf32>, vector<128x128xf32>, vector<8x128xf32> -> vector<8x128xf32>
      %c0_15 = arith.constant 0 : index
      %c0_16 = arith.constant 0 : index
      %25 = vector.load %arg6[%c0_15, %c0_16] : memref<1x128xf32, #tpu.memory_space<vmem>>, vector<1x128xf32>
      %26 = vector.broadcast %25 : vector<1x128xf32> to vector<8x128xf32>
      %27 = arith.addf %24, %26 : vector<8x128xf32>
      %cst_17 = arith.constant 0.000000e+00 : f32
      %28 = vector.broadcast %cst_17 : f32 to vector<8x128xf32>
      %29 = arith.maximumf %27, %28 : vector<8x128xf32>
      %c0_18 = arith.constant 0 : index
      %c0_19 = arith.constant 0 : index
      %30 = vector.load %arg7[%c0_18, %c0_19] : memref<8x128xf32, #tpu.memory_space<vmem>>, vector<8x128xf32>
      tpu.vector_store %arg7[%c0_18, %c0_19], %29 {strides = array<i32>} : memref<8x128xf32, #tpu.memory_space<vmem>>, vector<8x128xf32>,
    } else {
    }
    return
  }
  func.func @transform_0(%arg0: i32, %arg1: i32) -> (i32, i32) {
    %c0_i32 = arith.constant 0 : i32
    %c0_i32_0 = arith.constant 0 : i32
    return %arg1, %c0_i32 : i32, i32
  }
  func.func @transform_1(%arg0: i32, %arg1: i32) -> (i32, i32) {
    %c0_i32 = arith.constant 0 : i32
    %c0_i32_0 = arith.constant 0 : i32
    %c0_i32_1 = arith.constant 0 : i32
    return %c0_i32, %c0_i32_0 : i32, i32
  }
  func.func @transform_2(%arg0: i32, %arg1: i32) -> (i32, i32) {
    %c0_i32 = arith.constant 0 : i32
    %c0_i32_0 = arith.constant 0 : i32
    %c0_i32_1 = arith.constant 0 : i32
    return %c0_i32, %c0_i32_0 : i32, i32
  }
  func.func @transform_3(%arg0: i32, %arg1: i32) -> (i32, i32) {
    %c0_i32 = arith.constant 0 : i32
    %c0_i32_0 = arith.constant 0 : i32
    %c0_i32_1 = arith.constant 0 : i32
    return %c0_i32, %c0_i32_0 : i32, i32
  }
  func.func @transform_4(%arg0: i32, %arg1: i32) -> (i32, i32) {
    %c0_i32 = arith.constant 0 : i32
    %c0_i32_0 = arith.constant 0 : i32
    %c0_i32_1 = arith.constant 0 : i32
    return %c0_i32, %c0_i32_0 : i32, i32
  }
  func.func @transform_5(%arg0: i32, %arg1: i32) -> (i32, i32) {
    %0 = arith.muli %arg1, %arg0 : i32
    %c0_i32 = arith.constant 0 : i32
    %c0_i32_0 = arith.constant 0 : i32
    return %0, %c0_i32 : i32, i32
  }
}

</mosaic_0001>

<bundles_post_ra>
// kernel: tpu_custom_call.1
= control target key start
LH: loop header
LB: loop body
LE: loop exit
PB: predicated region body
PF: predicated region fallthrough
CT: control target
= control target key end

     0   :  { %10 = vsyncpa [#allocation7], 0  ;;  %s1135_s0 = inlined_call_operand.hbm [shape: f32[8,128], index: 0, kind: input, shape index: {}]   ;;  %s1136_s1 = inlined_call_operand.vmem [shape: f32[1,128], index: 1, kind: input, shape index: {}]   ;;  %s1137_s2 = inlined_call_operand.vmem [shape: f32[1,128], index: 2, kind: input, shape index: {}]   ;;  %s1138_s3 = inlined_call_operand.hbm [shape: f32[128,128], index: 3, kind: input, shape index: {}]   ;;  %s1139_s4 = inlined_call_operand.vmem [shape: f32[1,128], index: 4, kind: input, shape index: {}]   ;;  %s1140_s5 = inlined_call_operand.hbm [shape: f32[8,128], index: 5, kind: output, shape index: {}]  }
   0x1   :  { %11 = vsyncpa [#allocation10], 0 }
   0x2   :  { %12 = vsyncpa [#allocation8], 0 }
   0x3   :  { %14 = vsyncpa [#allocation8 + $0x1], 0  ;;  %s987_s18 = smov 0   ;;  %s989_s19 = smov 0  }
   0x4   :  { %s991_s20 = smov 0  }
   0x5 LB: > { %s646_s21 = sadd.s32 4294967295, %s943_s20   ;;  %s647_s22 = sadd.s32 4294967294, %s943_s20   ;;  %s943_s20 = sphi %s991_s20, %s20_s20   ;;  %s939_s19 = sphi %s989_s19, %s1151_s19   ;;  %s935_s18 = sphi %s987_s18, %s1150_s18  }
   0x6   : > { %s32_s23 = sadd.s32 1, %s939_s19  ;;  %p648_p0 = scmp.ge.s32.totalorder %s943_s20, 1 }
   0x7   : > { %p34_p1 = scmp.ge.s32.totalorder %s32_s23, 2  ;;  %p175_p2 = scmp.lt.s32.totalorder %s943_s20, 3 }
   0x8   : > { %p1009_p3 = scmp.eq.s32.totalorder %s646_s21, 0  ;;  %s945_s26 = smov [#allocation6]  }
   0x9   : > { %s1153_s23 = smov (%p34_p1, %s32_s23), 0  ;;  %p1015_p4 = pnand %p648_p0, %p175_p2 }
   0xa   : > { %s1144_s24 = scalar_select %p1009_p3, 1, 0 }
   0xb   : > { %s1145_s25 = scalar_select %p1015_p4, 1, 0 }
   0xc   : > { %s190_s27 = sshll.u32 %s945_s26, 4  ;;  %p771_p5 = pneg %p1015_p4  ;;  %s191_s27 = int_to_ptr.vmem [resolvable:$true] %s190_s27 }
   0xd   : > { %s946_s28 = smov [#allocation9]   ;;  %s827_s8 = scalar_lea.hbm %s1135_s0, 128 }
   0xe   : > { %s206_s29 = sshll.u32 %s946_s28, 4  ;;  %p1023_p6 = pnand %p1009_p3, %p771_p5  ;;  %s1027_s29 = int_to_ptr.vmem [resolvable:$true] %s206_s29 }
   0xf   : > { %p828_p7 = scmp.ne.s32.totalorder %s1135_s0, %s827_s8  ;;  %p834_p11 = scmp.lt.u32.totalorder %s827_s8, %s1135_s0 }
  0x10   : > { %p829_p8 = pneg %p1023_p6 }
  0x12   : > { %p830_p9 = pnand %p829_p8, %p828_p7 }
  0x14   : > { %p831_p10 = pneg %p830_p9 }
  0x16   : > { %p836_p12 = pnand %p834_p11, %p831_p10 }
  0x18   : > { %839 = shalt.err (!%p836_p12)
}
  0x19   : > { %s840_s13 = scalar_lea.vmem %s191_s27, 128  ;;  %p848_p2 = scmp.lt.s32.totalorder %s191_s27, %s191_s27 }
  0x1a   : > { %p841_p13 = scmp.ne.s32.totalorder %s191_s27, %s840_s13  ;;  %p849_p5 = scmp.lt.s32.totalorder %s840_s13, %s840_s13 }
  0x1c   : > { %p843_p0 = pnand %p841_p13, %p829_p8  ;;  %p850_p3 = por %p849_p5, %p848_p2 }
  0x1e   : > { %p844_p1 = pneg %p843_p0 }
  0x20   : > { %p851_p4 = pnand %p850_p3, %p844_p1 }
  0x22   : > { %854 = shalt.err (!%p851_p4)
}
  0x23   : > { %774 = dma.hbm_to_vmem [thread:$0]  (!%p1023_p6), %s1135_s0, 128, %s191_s27, [#allocation7]  }
  0x24   : > { %s855_s26 = scalar_lea.hbm %s1138_s3, 2048 }
  0x25   : > { %p856_p7 = scmp.ne.s32.totalorder %s1138_s3, %s855_s26  ;;  %p862_p4 = scmp.lt.u32.totalorder %s855_s26, %s1138_s3 }
  0x27   : > { %p858_p9 = pnand %p856_p7, %p829_p8 }
  0x29   : > { %p859_p3 = pneg %p858_p9 }
  0x2b   : > { %p864_p10 = pnand %p862_p4, %p859_p3 }
  0x2d   : > { %867 = shalt.err (!%p864_p10)
}
  0x2e   : > { %s868_s27 = scalar_lea.vmem %s1027_s29, 2048  ;;  %p876_p0 = scmp.lt.s32.totalorder %s1027_s29, %s1027_s29 }
  0x2f   : > { %p869_p11 = scmp.ne.s32.totalorder %s1027_s29, %s868_s27  ;;  %p877_p1 = scmp.lt.s32.totalorder %s868_s27, %s868_s27 }
  0x31   : > { %p871_p12 = pnand %p869_p11, %p829_p8  ;;  %p878_p2 = por %p877_p1, %p876_p0 }
  0x33   : > { %p872_p13 = pneg %p871_p12 }
  0x35   : > { %p879_p5 = pnand %p878_p2, %p872_p13 }
  0x37   : > { %882 = shalt.err (!%p879_p5)
}
  0x38   : > { %s947_s9 = smov 128   ;;  %s948_s10 = smov 8  }
  0x39   : > { %777 = dma.hbm_to_vmem [thread:$0]  (!%p1023_p6), %s1138_s3, 2048, %s1027_s29, [#allocation10], %s947_s9, %s947_s9, %s948_s10  }
  0x3a   : > { %p1147_p7 = scmp.ne.s32.totalorder %s1145_s25, 0 }
  0x3b   : > { %p1148_p8 = scmp.ne.s32.totalorder (!%p1147_p7), %s1144_s24, 0 }
  0x3c   : > { %225 = sbr.rel (%p1147_p7) target bundleno = 640 (0x280), region = 40 }
  0x43   : > { %922 = dma.done.wait (%p1148_p8), [#allocation7], 128  }
  0x44   : > { %924 = vsyncadd (%p1148_p8), [#allocation7], 4294967168 }
  0x45   : > { %926 = dma.done.wait (%p1148_p8), [#allocation10], 2048  }
  0x46   : > { %928 = vsyncadd (%p1148_p8), [#allocation10], 4294965248  ;;  %p253_p9 = scmp.eq.s32.totalorder %s935_s18, 0 }
  0x47   : > { %v949_v0 = vmov (%p253_p9), 0.0  }
  0x48   : > { %258 = sbr.rel (!%p253_p9) target bundleno = 79 (0x4f), region = 52  ;;  %259 = vst [vmem:[#allocation2] sm:$0x1] (%p253_p9), %v949_v0  ;;  %260 = vst [vmem:[#allocation3] sm:$0x1] (%p253_p9), %v949_v0 }
  0x4f PF: > { %p655_p6 = scmp.ne.s32.totalorder %s935_s18, 0 }
  0x50   : > { %v264_v1 = vld [vmem:[#allocation6] sm:$0xff] (!%p655_p6)  ;;  %vm266_vm0 = vcmask (!%p655_p6), 64512   ;;  %v950_v2 = vmov (!%p655_p6), 0.0   ;;  %vm951_vm1 = vmmov (!%p655_p6), 0   ;;  %v952_v4 = vmov (!%p655_p6), 1.0  }
  0x51   : > { %263 = sbr.rel (%p655_p6) target bundleno = 300 (0x12c), region = 56  ;;  %690 = vmatprep.subr.mxu0 (!%p655_p6), %v950_v2  ;;  %692 = vmatprep.mubr.msk.f32.mxu0 (!%p655_p6), %vm951_vm1, %v950_v2  ;;  %v343_v3 = vmul.f32 (!%p655_p6), %v264_v1, %v264_v1  ;;  %v265_v5 = vld [vmem:[#allocation2] sm:$0x1] (!%p655_p6)  ;;  %v342_v7 = vld [vmem:[#allocation3] sm:$0x1] (!%p655_p6) }
  0x52   : > { %691 = vmatpush3.msra.mxu0 (!%p655_p6), %v264_v1  ;;  %695 = vmatprep.subr.mxu1 (!%p655_p6), %v950_v2 }
  0x53   : > { %693 = vmatmul.mubr.msk.f32.vlgmr.msra.gmra.mrb[0].mxu0 (!%p655_p6), %vm266_vm0, %v952_v4  ;;  %696 = vmatpush3.msra.mxu1 (!%p655_p6), %v343_v3 }
  0x54   : > { %697 = vmatprep.mubr.msk.f32.mxu1 (!%p655_p6), %vm951_vm1, %v950_v2 }
  0x55   : > { %698 = vmatmul.mubr.msk.f32.vlgmr.msra.gmra.mrb[0].mxu1 (!%p655_p6), %vm266_vm0, %v952_v4 }
 0x126   : > { %v336_v6 = vpop.f32.mrb[0].mxu0 }
 0x127   : > { %v340_v8 = vadd.f32 %v336_v6, %v265_v5  ;;  %v694_v9 = vpop.f32.mrb[1].mxu0 }
 0x128   : > { %v410_v10 = vpop.f32.mrb[0].mxu1 }
 0x129   : > { %341 = vst [vmem:[#allocation2] sm:$0x1] %v340_v8  ;;  %v414_v11 = vadd.f32 %v410_v10, %v342_v7  ;;  %v699_v12 = vpop.f32.mrb[1].mxu1 }
 0x12b   : > { %415 = vst [vmem:[#allocation3] sm:$0x1] %v414_v11 }
 0x12c PF: > { %p416_p3 = scmp.eq.s32.totalorder %s935_s18, 1 }
 0x12d   : > { %v428_v21 = vld [vmem:[%s1136_s1] sm:$0x1] (%p416_p3) }
 0x12e   : > { %420 = sbr.rel (!%p416_p3) target bundleno = 333 (0x14d), region = 60  ;;  %v433_v24 = vld [vmem:[%s1137_s2] sm:$0x1] (%p416_p3) }
 0x130   : > { %v421_v13 = vld [vmem:[#allocation2] sm:$0x1] (%p416_p3) }
 0x131   : > { %v422_v15 = vmul.f32 (%p416_p3), 0.125, %v421_v13 }
 0x132   : > { %v423_v14 = vld [vmem:[#allocation3] sm:$0x1] (%p416_p3) }
 0x133   : > { %v424_v16 = vmul.f32 (%p416_p3), 0.125, %v423_v14  ;;  %v425_v17 = vmul.f32 (%p416_p3), %v422_v15, %v422_v15 }
 0x135   : > { %v426_v18 = vsub.f32 %v424_v16, %v425_v17 }
 0x137   : > { %v427_v19 = vmax.f32 %v426_v18, 0.0 }
 0x139   : > { %v429_v20 = vadd.f32 1e-05, %v427_v19 }
 0x13b   : > { %825 = vrsqrt.f32 %v429_v20 }
 0x145   : > { %v826_v22 = vpop.eup %825 }
 0x146   : > { %v431_v23 = vmul.f32 %v826_v22, %v428_v21 }
 0x148   : > { %432 = vst [vmem:[#allocation4] sm:$0x1] %v431_v23  ;;  %v434_v25 = vmul.f32 %v431_v23, %v422_v15 }
 0x14a   : > { %v435_v26 = vsub.f32 %v433_v24, %v434_v25 }
 0x14c   : > { %436 = vst [vmem:[#allocation5] sm:$0x1] %v435_v26 }
 0x14d PF: > { %p659_p4 = scmp.ne.s32.totalorder %s935_s18, 1 }
 0x14e   : > { %v457_v27 = vld [vmem:[#allocation9] sm:$0xff] (!%p659_p4)  ;;  %v458_v28 = vld [vmem:[#allocation9 + $0x8] sm:$0xff] (!%p659_p4)  ;;  %v953_v29 = vmov (!%p659_p4), 0.0|0.0   ;;  %vm954_vm2 = vmmov (!%p659_p4), 0   ;;  %v955_v31 = vmov (!%p659_p4), 0.0   ;;  %v459_v32 = vld [vmem:[#allocation9 + $0x10] sm:$0xff] (!%p659_p4) }
 0x14f   : > { %439 = sbr.rel (%p659_p4) target bundleno = 617 (0x269), region = 64  ;;  %735 = vmatprep.subr.bf16.mxu0 (!%p659_p4), %v953_v29  ;;  %v736_v30 = vpack.c.bf16 (!%p659_p4), %v458_v28, %v457_v27  ;;  %732 = vmatprep.mubr.msk.f32.mxu0 (!%p659_p4), %vm954_vm2, %v955_v31  ;;  %v460_v33 = vld [vmem:[#allocation9 + $0x18] sm:$0xff] (!%p659_p4)  ;;  %v461_v35 = vld [vmem:[#allocation9 + $0x20] sm:$0xff] (!%p659_p4)  ;;  %v462_v36 = vld [vmem:[#allocation9 + $0x28] sm:$0xff] (!%p659_p4) }
 0x150   : > { %v739_v34 = vpack.c.bf16 (!%p659_p4), %v460_v33, %v459_v32  ;;  %v742_v37 = vpack.c.bf16 (!%p659_p4), %v462_v36, %v461_v35  ;;  %v463_v38 = vld [vmem:[#allocation9 + $0x30] sm:$0xff] (!%p659_p4)  ;;  %v464_v39 = vld [vmem:[#allocation9 + $0x38] sm:$0xff] (!%p659_p4)  ;;  %v465_v41 = vld [vmem:[#allocation9 + $0x40] sm:$0xff] (!%p659_p4) }
 0x151   : > { %737 = vmatpush3.bf16.xpose.msra.mxu0 (!%p659_p4), %v736_v30  ;;  %v745_v40 = vpack.c.bf16 (!%p659_p4), %v464_v39, %v463_v38  ;;  %v466_v42 = vld [vmem:[#allocation9 + $0x48] sm:$0xff] (!%p659_p4)  ;;  %v467_v44 = vld [vmem:[#allocation9 + $0x50] sm:$0xff] (!%p659_p4)  ;;  %v468_v45 = vld [vmem:[#allocation9 + $0x58] sm:$0xff] (!%p659_p4) }
 0x152   : > { %738 = vmatprep.subr.bf16.mxu0 (!%p659_p4), %v953_v29  ;;  %v748_v43 = vpack.c.bf16 (!%p659_p4), %v466_v42, %v465_v41  ;;  %v751_v46 = vpack.c.bf16 (!%p659_p4), %v468_v45, %v467_v44  ;;  %v469_v47 = vld [vmem:[#allocation9 + $0x60] sm:$0xff] (!%p659_p4)  ;;  %v470_v48 = vld [vmem:[#allocation9 + $0x68] sm:$0xff] (!%p659_p4)  ;;  %v471_v50 = vld [vmem:[#allocation9 + $0x70] sm:$0xff] (!%p659_p4) }
 0x153   : > { %v754_v49 = vpack.c.bf16 (!%p659_p4), %v470_v48, %v469_v47  ;;  %v472_v51 = vld [vmem:[#allocation9 + $0x78] sm:$0xff] (!%p659_p4)  ;;  %v660_v54 = vld [vmem:[#allocation4] ss:$0 sm:$0xff] (!%p659_p4)  ;;  %v661_v56 = vld [vmem:[#allocation5] ss:$0 sm:$0xff] (!%p659_p4) }
 0x154   : > { %v757_v52 = vpack.c.bf16 (!%p659_p4), %v472_v51, %v471_v50  ;;  %v440_v53 = vld [vmem:[#allocation6] sm:$0xff] (!%p659_p4)  ;;  %v662_v58 = vld [vmem:[%s1139_s4] ss:$0 sm:$0xff] (!%p659_p4) }
 0x155   : > { %v448_v55 = vmul.f32 (!%p659_p4), %v660_v54, %v440_v53 }
 0x157   : > { %v456_v57 = vadd.f32 %v661_v56, %v448_v55 }
 0x159   : > { %740 = vmatpush3.bf16.xpose.msra.mxu0 %v739_v34 }
 0x15a   : > { %741 = vmatprep.subr.bf16.mxu0 %v953_v29 }
 0x161   : > { %743 = vmatpush3.bf16.xpose.msra.mxu0 %v742_v37 }
 0x162   : > { %744 = vmatprep.subr.bf16.mxu0 %v953_v29 }
 0x169   : > { %746 = vmatpush3.bf16.xpose.msra.mxu0 %v745_v40 }
 0x16a   : > { %747 = vmatprep.subr.bf16.mxu0 %v953_v29 }
 0x171   : > { %749 = vmatpush3.bf16.xpose.msra.mxu0 %v748_v43 }
 0x172   : > { %750 = vmatprep.subr.bf16.mxu0 %v953_v29 }
 0x179   : > { %752 = vmatpush3.bf16.xpose.msra.mxu0 %v751_v46 }
 0x17a   : > { %753 = vmatprep.subr.bf16.mxu0 %v953_v29 }
 0x181   : > { %755 = vmatpush3.bf16.xpose.msra.mxu0 %v754_v49 }
 0x182   : > { %756 = vmatprep.subr.bf16.mxu0 %v953_v29 }
 0x189   : > { %758 = vmatpush3.bf16.xpose.msra.mxu0 %v757_v52 }
 0x190   : > { %733 = vmatmul.mubr.f32.vlgmr.msra.gmra.mrb[0].mxu0 %v456_v57 }
 0x263   : > { %v546_v59 = vpop.f32.mrb[0].mxu0 }
 0x264   : > { %v547_v60 = vadd.f32 %v662_v58, %v546_v59  ;;  %v734_v61 = vpop.f32.mrb[1].mxu0 }
 0x266   : > { %v550_v62 = vmax.f32 %v547_v60, 0.0 }
 0x268   : > { %551 = vst [vmem:[#allocation11] sm:$0xff] %v550_v62 }
 0x269 PF: > { %p1101_p10 = scmp.eq.s32.totalorder %s646_s21, 1  ;;  %s956_s15 = smov [#allocation11]  }
 0x26a   : > { %s567_s16 = sshll.u32 %s956_s15, 4  ;;  %s568_s16 = int_to_ptr.vmem [resolvable:$true] %s567_s16 }
 0x26b   : > { %s883_s17 = scalar_lea.vmem %s568_s16, 128  ;;  %s889_s26 = scalar_lea.vmem %s568_s16, 256 }
 0x26c   : > { %p884_p11 = scmp.ne.s32.totalorder %s568_s16, %s883_s17  ;;  %p890_p0 = scmp.lt.s32.totalorder %s568_s16, %s568_s16 }
 0x26d   : > { %p891_p1 = scmp.lt.s32.totalorder %s889_s26, %s883_s17 }
 0x26e   : > { %p885_p12 = pnand %p884_p11, %p1101_p10 }
 0x26f   : > { %p892_p2 = por %p891_p1, %p890_p0 }
 0x270   : > { %p886_p13 = pneg %p885_p12 }
 0x272   : > { %p893_p5 = pnand %p892_p2, %p886_p13 }
 0x274   : > { %896 = shalt.err (!%p893_p5)
}
 0x275   : > { %s897_s6 = scalar_lea.hbm %s1140_s5, 128 }
 0x276   : > { %p898_p7 = scmp.ne.s32.totalorder %s1140_s5, %s897_s6  ;;  %p903_p6 = scmp.lt.u32.totalorder %s897_s6, %s1140_s5 }
 0x278   : > { %p899_p8 = pnand %p898_p7, %p1101_p10 }
 0x27a   : > { %p900_p9 = pneg %p899_p8 }
 0x27c   : > { %p905_p3 = pnand %p903_p6, %p900_p9 }
 0x27e   : > { %908 = shalt.err (!%p905_p3)
}
 0x27f   : > { %768 = dma.vmem_to_hbm [thread:$0]  (%p1101_p10), %s568_s16, 128, %s1140_s5, [#allocation8]  }
 0x280 PF: > { %p787_p4 = scmp.ge.s32.totalorder %s943_s20, 2  ;;  %p788_p11 = scmp.eq.s32.totalorder %s647_s22, 1 }
 0x282   : > { %p779_p12 = pnand %p788_p11, %p787_p4 }
 0x284   : > { %930 = dma.done.wait (!%p779_p12), [#allocation8], 128  }
 0x285   : > { %932 = vsyncadd (!%p779_p12), [#allocation8], 4294967168  ;;  %s20_s20 = sadd.s32 1, %s943_s20   ;;  %s1150_s18 = smov %s939_s19 }
 0x286   : > { %p17_p13 = scmp.ge.s32.totalorder %s20_s20, 4   ;;  %s1151_s19 = smov %s1153_s23 }
 0x288   :  { %19 = sbr.rel (!%p17_p13) target bundleno = 5 (0x5), region = 98 }
 0x28f   :  { %585 = vsyncpa [#allocation7], 1 }
 0x290   :  { %587 = vsyncpa [#allocation7 + $0x1], 1 }
 0x291   :  { %588 = vsyncpa [#allocation10], 1 }
 0x292   :  { %589 = vsyncpa [#allocation8], 1 }
 0x293   :  { %591 = vsyncpa [#allocation8 + $0x1], 1 }

</bundles_post_ra>
